<compile_context>
chip_gen: v6e
topology: v6e:2x2x1
jax: 0.10.0
libtpu: 0.0.40
codegen_flags: <defaults>
</compile_context>

<pallas_src>
import functools

import numpy as np
import jax
import jax.numpy as jnp
from jax.experimental import pallas as pl
from jax.experimental.pallas import tpu as pltpu


# -----------------------------------------------------------------------------
# Pallas kernel
# -----------------------------------------------------------------------------
def deeptree_kernel(x_ref, w_ref, b_ref, m_ref, bits_ref, pi_ref, out_ref):
    # x_ref   : [TB, n_in]             batch tile (f32 or bf16)
    # w_ref   : [n_leaf, n_in]         folded (feature_mask @ w)^T (same dtype as x)
    # b_ref   : [n_leaf, 1]            linear bias (f32)
    # m_ref   : [depth, n_leaf, n_leaf] per-layer routing matrices, entries {-1,0,+1} (f32)
    # bits_ref: [depth, n_leaf, 1]     per-layer routing bit offsets (f32)
    # pi_ref  : [n_class, n_leaf]      softmax(pi)^T (f32, precomputed)
    # out_ref : [n_class, TB]          log-probs, transposed (lane-dense store)
    depth = m_ref.shape[0]

    # logits[leaf, b] = sum_i w_eff[leaf, i] * x[b, i]   -> [n_leaf, TB]
    # (A @ B^T form; any x-side transpose Mosaic inserts rides the XLU slot and
    #  is hidden under the x DMA in this mem-bound regime.)
    logits = jax.lax.dot_general(
        w_ref[...], x_ref[...],
        dimension_numbers=(((1,), (1,)), ((), ())),
        preferred_element_type=jnp.float32)
    d = jax.nn.sigmoid(logits + b_ref[...])                      # [n_leaf, TB] f32

    # Per-layer routing: route_l = M_l @ d + bits_l ; mu = prod_l route_l.
    # Peak VMEM stays O(n_leaf*TB) (vs O(depth*n_leaf*TB) for a fused matmul),
    # so deep trees fit v7x's smaller VMEM.  All routing math stays f32.
    mu = jnp.dot(m_ref[0], d, preferred_element_type=jnp.float32) + bits_ref[0]
    for l in range(1, depth):                                    # static unroll
        mu = mu * (jnp.dot(m_ref[l], d, preferred_element_type=jnp.float32)
                   + bits_ref[l])

    # class_probs^T = softmax(pi)^T @ mu -> [n_class, TB]; log-softmax over classes.
    cp = jnp.dot(pi_ref[...], mu, preferred_element_type=jnp.float32)
    cmax = jnp.max(cp, axis=0, keepdims=True)
    lse = cmax + jnp.log(jnp.sum(jnp.exp(cp - cmax), axis=0, keepdims=True))
    out_ref[...] = (cp - lse).astype(out_ref.dtype)


# -----------------------------------------------------------------------------
# Host-side routing tables (cached per depth; built once, not per forward).
# -----------------------------------------------------------------------------
@functools.lru_cache(maxsize=None)
def _routing_tables_np(depth):
    """M [depth, n_leaf, n_leaf] (entries {-1,0,+1}) and bits [depth, n_leaf, 1]
    such that, for d of shape [n_leaf, B]:
        route_l = M[l] @ d + bits[l]
        route_l[j] = d[node_l(j)]      if leaf j goes left at layer l
                   = 1 - d[node_l(j)]  if it goes right
    """
    n_leaf = 2 ** depth
    M = np.zeros((depth, n_leaf, n_leaf), np.float32)
    bits = np.zeros((depth, n_leaf, 1), np.float32)
    for l in range(depth):
        for j in range(n_leaf):
            node = 2 ** l + (j >> (depth - l))     # decision index used
            bit = (j >> (depth - 1 - l)) & 1       # 0 = left (d), 1 = right (1-d)
            M[l, j, node] = 1.0 if bit == 0 else -1.0
            bits[l, j, 0] = float(bit)
    return M, bits


# -----------------------------------------------------------------------------
# Param folding (module init time) + jitted per-step apply.
# -----------------------------------------------------------------------------
def make_deeptree_params(feature_mask, w, b, pi, depth, *, dtype=jnp.bfloat16):
    """Fold all constants once.  Only x / w_eff take `dtype` (bf16 default);
    routing tables, bias and softmax(pi) stay f32 (negligible bytes, exact)."""
    n_leaf = 2 ** depth
    w_eff_t = (feature_mask.astype(jnp.float32)
               @ w.astype(jnp.float32)).T.astype(dtype)          # [n_leaf, n_in]
    b_col = b.reshape(n_leaf, 1).astype(jnp.float32)             # [n_leaf, 1]
    m_np, bits_np = _routing_tables_np(depth)
    pi_t = jax.nn.softmax(pi.astype(jnp.float32), axis=-1).T     # [n_class, n_leaf]
    return dict(w_eff_t=w_eff_t, b_col=b_col,
                m=jnp.asarray(m_np), bits=jnp.asarray(bits_np), pi_t=pi_t)


@functools.partial(jax.jit, static_argnames=("block_b",))
def deeptree_apply(params, x, *, block_b=8192):
    """Forward pass; returns [B, n_class] f32 log-probs."""
    w_eff_t = params["w_eff_t"]
    b_col = params["b_col"]
    m = params["m"]
    bits = params["bits"]
    pi_t = params["pi_t"]

    B, n_in = x.shape
    n_leaf = w_eff_t.shape[0]
    n_class = pi_t.shape[0]
    depth = m.shape[0]
    dtype = w_eff_t.dtype
    dtype_bytes = jnp.dtype(dtype).itemsize

    if x.dtype != dtype:
        # For full HBM savings callers should already pass x in `dtype`.
        x = x.astype(dtype)

    # ---- batch tile selection (no host-side padding of x) ----
    if block_b >= B:
        tb, n_blocks = B, 1                      # single full block (exact dims)
    else:
        tb = max(128, (block_b // 128) * 128)    # lane-dense out store
        # keep an x tile <= ~4 MiB so double-buffering fits every generation
        tb_cap = max(128, ((4 << 20) // (n_in * dtype_bytes)) // 128 * 128)
        tb = min(tb, tb_cap)
        n_blocks = pl.cdiv(B, tb)                # ragged last block handled by Pallas

    # ---- scoped-VMEM budget: double-buffered x + out, intermediates, constants ----
    vmem_bytes = (2 * tb * n_in * dtype_bytes
                  + 2 * n_class * tb * 4
                  + 6 * n_leaf * tb * 4
                  + 2 * (n_leaf * n_in * dtype_bytes
                         + depth * n_leaf * (n_leaf + 1) * 4
                         + n_class * n_leaf * 4 + n_leaf * 4))
    # >= 32 MiB raises v5e's 16 MiB scoped default; <= 48 MiB is safe on v7x's 64 MiB.
    vmem_limit = int(min(48 << 20, max(32 << 20, 2 * vmem_bytes)))

    full = lambda a: pl.BlockSpec(a.shape, lambda i: (0,) * a.ndim)
    out_t = pl.pallas_call(
        deeptree_kernel,
        out_shape=jax.ShapeDtypeStruct((n_class, B), jnp.float32),
        grid_spec=pltpu.PrefetchScalarGridSpec(
            num_scalar_prefetch=0,
            grid=(n_blocks,),
            in_specs=[
                pl.BlockSpec((tb, n_in), lambda i: (i, 0)),      # x tile
                full(w_eff_t),
                full(b_col),
                full(m),
                full(bits),
                full(pi_t),
            ],
            out_specs=pl.BlockSpec((n_class, tb), lambda i: (0, i)),
        ),
        compiler_params=pltpu.CompilerParams(
            dimension_semantics=("parallel",),       # feeds both TCs on v7x
            vmem_limit_bytes=vmem_limit),
    )(x, w_eff_t, b_col, m, bits, pi_t)

    return out_t.T                                   # [B, n_class] f32


def deeptree_forward(x, feature_mask, w, b, pi, depth, *,
                     block_b=8192, dtype=jnp.bfloat16):
    """Convenience one-shot wrapper (prefer make_deeptree_params + deeptree_apply)."""
    params = make_deeptree_params(feature_mask, w, b, pi, depth, dtype=dtype)
    return deeptree_apply(params, x, block_b=block_b)


# -----------------------------------------------------------------------------
# Pure-JAX reference (mirrors the PyTorch forward literally).
# -----------------------------------------------------------------------------
def deeptree_reference(x, feature_mask, w, b, pi, depth):
    feats = x @ feature_mask
    d = jax.nn.sigmoid(feats @ w + b)                 # [B, n_leaf]
    decision = jnp.stack([d, 1.0 - d], axis=2)        # [B, n_leaf, 2]
    B = x.shape[0]
    mu = jnp.ones((B, 1, 1), jnp.float32)
    begin, end = 1, 2
    for l in range(depth):
        mu = jnp.repeat(mu.reshape(B, -1, 1), 2, axis=2)
        mu = mu * decision[:, begin:end, :]
        begin = end
        end = begin + 2 ** (l + 1)
    mu = mu.reshape(B, 2 ** depth)
    pi_sm = jax.nn.softmax(pi, axis=-1)
    cp = mu @ pi_sm
    return jax.nn.log_softmax(cp, axis=1)


if __name__ == "__main__":
    # Small, module-consistent shapes; batch chosen NOT divisible by the tile so
    # the ragged-boundary (no-jnp.pad) path is exercised.
    depth = 3
    n_in_feature = 64
    used_feature_rate = 0.5
    n_class = 4
    batch = 200

    n_leaf = 2 ** depth
    n_used = int(n_in_feature * used_feature_rate)

    key = jax.random.PRNGKey(0)
    k_perm, k_pi, k_w, k_b, k_x = jax.random.split(key, 5)

    # feature_mask = eye(n_in)[randperm(n_in)[:n_used]].T  -> [n_in, n_used]
    perm = jax.random.permutation(k_perm, n_in_feature)[:n_used]
    feature_mask = jnp.eye(n_in_feature, dtype=jnp.float32)[perm].T

    pi = jax.random.uniform(k_pi, (n_leaf, n_class), dtype=jnp.float32)
    # Linear(n_used -> n_leaf): weight stored as [n_used, n_leaf], bias [1, n_leaf]
    w = jax.random.uniform(k_w, (n_used, n_leaf), dtype=jnp.float32,
                           minval=-0.2, maxval=0.2)
    b = jax.random.uniform(k_b, (1, n_leaf), dtype=jnp.float32,
                           minval=-0.2, maxval=0.2)
    x = jax.random.normal(k_x, (batch, n_in_feature), dtype=jnp.float32)

    ref = deeptree_reference(x, feature_mask, w, b, pi, depth)

    # f32, multi-block with a ragged last block (grid=(2,), 72 valid rows in block 1).
    p_f32 = make_deeptree_params(feature_mask, w, b, pi, depth, dtype=jnp.float32)
    out_a = jax.block_until_ready(deeptree_apply(p_f32, x, block_b=128))
    np.testing.assert_allclose(np.asarray(out_a), np.asarray(ref),
                               rtol=3e-5, atol=3e-5)

    # f32, single full-batch block (default large block_b >= B).
    out_b = jax.block_until_ready(deeptree_apply(p_f32, x))
    np.testing.assert_allclose(np.asarray(out_b), np.asarray(ref),
                               rtol=3e-5, atol=3e-5)

    # bf16 x / w_eff stream (production default). Routing tables, pi, sigmoid,
    # routing product and log-softmax all stay f32 -> much tighter tolerance
    # than a full-bf16 path.
    p_bf16 = make_deeptree_params(feature_mask, w, b, pi, depth, dtype=jnp.bfloat16)
    out_c = jax.block_until_ready(
        deeptree_apply(p_bf16, x.astype(jnp.bfloat16), block_b=128))
    np.testing.assert_allclose(np.asarray(out_c), np.asarray(ref),
                               rtol=3e-2, atol=3e-2)

    print("KERNEL_OK")
</pallas_src>

<mosaic_0001>
module attributes {stable_mosaic.version = 11 : i64} {
  func.func @deeptree_kernel(%arg0: i32, %arg1: memref<128x64xf32, #tpu.memory_space<vmem>>, %arg2: memref<8x64xf32, #tpu.memory_space<vmem>>, %arg3: memref<8x1xf32, #tpu.memory_space<vmem>>, %arg4: memref<3x8x8xf32, #tpu.memory_space<vmem>>, %arg5: memref<3x8x1xf32, #tpu.memory_space<vmem>>, %arg6: memref<4x8xf32, #tpu.memory_space<vmem>>, %arg7: memref<4x128xf32, #tpu.memory_space<vmem>>) attributes {dimension_semantics = [#tpu.dimension_semantics<parallel>], iteration_bounds = array<i64: 2>, scalar_prefetch = 0 : i64, scratch_operands = 0 : i64, tpu.core_type = #tpu.core_type<tc>, window_params = [{transform_indices = @transform_0, window_bounds = array<i64: 128, 64>}, {pipeline_mode = #tpu.pipeline_mode<synchronous>, transform_indices = @transform_1, window_bounds = array<i64: 8, 64>}, {pipeline_mode = #tpu.pipeline_mode<synchronous>, transform_indices = @transform_2, window_bounds = array<i64: 8, 1>}, {pipeline_mode = #tpu.pipeline_mode<synchronous>, transform_indices = @transform_3, window_bounds = array<i64: 3, 8, 8>}, {pipeline_mode = #tpu.pipeline_mode<synchronous>, transform_indices = @transform_4, window_bounds = array<i64: 3, 8, 1>}, {pipeline_mode = #tpu.pipeline_mode<synchronous>, transform_indices = @transform_5, window_bounds = array<i64: 4, 8>}, {transform_indices = @transform_6, window_bounds = array<i64: 4, 128>}]} {
    %c0 = arith.constant 0 : index
    %c0_0 = arith.constant 0 : index
    %0 = vector.load %arg2[%c0, %c0_0] : memref<8x64xf32, #tpu.memory_space<vmem>>, vector<8x64xf32>
    %c0_1 = arith.constant 0 : index
    %c0_2 = arith.constant 0 : index
    %1 = vector.load %arg1[%c0_1, %c0_2] : memref<128x64xf32, #tpu.memory_space<vmem>>, vector<128x64xf32>
    %cst = arith.constant dense<0.000000e+00> : vector<8x128xf32>
    %2 = tpu.matmul %0, %1, %cst {dimension_numbers = #tpu.dot_dimension_numbers<[1], [1], [0], [0], [0, 0, 1, 0], [], []>} : vector<8x64xf32>, vector<128x64xf32>, vector<8x128xf32> -> vector<8x128xf32>
    %c0_3 = arith.constant 0 : index
    %c0_4 = arith.constant 0 : index
    %3 = vector.load %arg3[%c0_3, %c0_4] : memref<8x1xf32, #tpu.memory_space<vmem>>, vector<8x1xf32>
    %4 = vector.broadcast %3 : vector<8x1xf32> to vector<8x128xf32>
    %5 = arith.addf %2, %4 : vector<8x128xf32>
    %6 = arith.negf %5 : vector<8x128xf32>
    %7 = math.exp %6 : vector<8x128xf32>
    %cst_5 = arith.constant 1.000000e+00 : f32
    %8 = vector.broadcast %cst_5 : f32 to vector<8x128xf32>
    %9 = arith.addf %8, %7 : vector<8x128xf32>
    %10 = arith.divf %8, %9 : vector<8x128xf32>
    %c0_6 = arith.constant 0 : index
    %c0_7 = arith.constant 0 : index
    %c0_8 = arith.constant 0 : index
    %11 = vector.load %arg4[%c0_6, %c0_7, %c0_8] : memref<3x8x8xf32, #tpu.memory_space<vmem>>, vector<1x8x8xf32>
    %12 = vector.shape_cast %11 : vector<1x8x8xf32> to vector<8x8xf32>
    %cst_9 = arith.constant dense<0.000000e+00> : vector<8x128xf32>
    %13 = tpu.matmul %12, %10, %cst_9 {dimension_numbers = #tpu.dot_dimension_numbers<[1], [0], [0], [1], [0, 0, 1, 1], [], []>} : vector<8x8xf32>, vector<8x128xf32>, vector<8x128xf32> -> vector<8x128xf32>
    %c0_10 = arith.constant 0 : index
    %c0_11 = arith.constant 0 : index
    %c0_12 = arith.constant 0 : index
    %14 = vector.load %arg5[%c0_10, %c0_11, %c0_12] : memref<3x8x1xf32, #tpu.memory_space<vmem>>, vector<1x8x1xf32>
    %15 = vector.shape_cast %14 : vector<1x8x1xf32> to vector<8x1xf32>
    %16 = vector.broadcast %15 : vector<8x1xf32> to vector<8x128xf32>
    %17 = arith.addf %13, %16 : vector<8x128xf32>
    %c1 = arith.constant 1 : index
    %c0_13 = arith.constant 0 : index
    %c0_14 = arith.constant 0 : index
    %18 = vector.load %arg4[%c1, %c0_13, %c0_14] : memref<3x8x8xf32, #tpu.memory_space<vmem>>, vector<1x8x8xf32>
    %19 = vector.shape_cast %18 : vector<1x8x8xf32> to vector<8x8xf32>
    %cst_15 = arith.constant dense<0.000000e+00> : vector<8x128xf32>
    %20 = tpu.matmul %19, %10, %cst_15 {dimension_numbers = #tpu.dot_dimension_numbers<[1], [0], [0], [1], [0, 0, 1, 1], [], []>} : vector<8x8xf32>, vector<8x128xf32>, vector<8x128xf32> -> vector<8x128xf32>
    %c1_16 = arith.constant 1 : index
    %c0_17 = arith.constant 0 : index
    %c0_18 = arith.constant 0 : index
    %21 = vector.load %arg5[%c1_16, %c0_17, %c0_18] : memref<3x8x1xf32, #tpu.memory_space<vmem>>, vector<1x8x1xf32>
    %22 = vector.shape_cast %21 : vector<1x8x1xf32> to vector<8x1xf32>
    %23 = vector.broadcast %22 : vector<8x1xf32> to vector<8x128xf32>
    %24 = arith.addf %20, %23 : vector<8x128xf32>
    %25 = arith.mulf %17, %24 : vector<8x128xf32>
    %c2 = arith.constant 2 : index
    %c0_19 = arith.constant 0 : index
    %c0_20 = arith.constant 0 : index
    %26 = vector.load %arg4[%c2, %c0_19, %c0_20] : memref<3x8x8xf32, #tpu.memory_space<vmem>>, vector<1x8x8xf32>
    %27 = vector.shape_cast %26 : vector<1x8x8xf32> to vector<8x8xf32>
    %cst_21 = arith.constant dense<0.000000e+00> : vector<8x128xf32>
    %28 = tpu.matmul %27, %10, %cst_21 {dimension_numbers = #tpu.dot_dimension_numbers<[1], [0], [0], [1], [0, 0, 1, 1], [], []>} : vector<8x8xf32>, vector<8x128xf32>, vector<8x128xf32> -> vector<8x128xf32>
    %c2_22 = arith.constant 2 : index
    %c0_23 = arith.constant 0 : index
    %c0_24 = arith.constant 0 : index
    %29 = vector.load %arg5[%c2_22, %c0_23, %c0_24] : memref<3x8x1xf32, #tpu.memory_space<vmem>>, vector<1x8x1xf32>
    %30 = vector.shape_cast %29 : vector<1x8x1xf32> to vector<8x1xf32>
    %31 = vector.broadcast %30 : vector<8x1xf32> to vector<8x128xf32>
    %32 = arith.addf %28, %31 : vector<8x128xf32>
    %33 = arith.mulf %25, %32 : vector<8x128xf32>
    %c0_25 = arith.constant 0 : index
    %c0_26 = arith.constant 0 : index
    %34 = vector.load %arg6[%c0_25, %c0_26] : memref<4x8xf32, #tpu.memory_space<vmem>>, vector<4x8xf32>
    %cst_27 = arith.constant dense<0.000000e+00> : vector<4x128xf32>
    %35 = tpu.matmul %34, %33, %cst_27 {dimension_numbers = #tpu.dot_dimension_numbers<[1], [0], [0], [1], [0, 0, 1, 1], [], []>} : vector<4x8xf32>, vector<8x128xf32>, vector<4x128xf32> -> vector<4x128xf32>
    %cst_28 = arith.constant dense<0xFF800000> : vector<128xf32>
    %36 = vector.multi_reduction <maximumf>, %35, %cst_28 [0] : vector<4x128xf32> to vector<128xf32>
    %37 = vector.shape_cast %36 : vector<128xf32> to vector<1x128xf32>
    %38 = vector.broadcast %37 : vector<1x128xf32> to vector<4x128xf32>
    %39 = arith.subf %35, %38 : vector<4x128xf32>
    %40 = math.exp %39 : vector<4x128xf32>
    %cst_29 = arith.constant dense<0.000000e+00> : vector<128xf32>
    %41 = vector.multi_reduction <add>, %40, %cst_29 [0] : vector<4x128xf32> to vector<128xf32>
    %42 = vector.shape_cast %41 : vector<128xf32> to vector<1x128xf32>
    %43 = math.log %42 : vector<1x128xf32>
    %44 = arith.addf %37, %43 : vector<1x128xf32>
    %45 = vector.broadcast %44 : vector<1x128xf32> to vector<4x128xf32>
    %46 = arith.subf %35, %45 : vector<4x128xf32>
    %c0_30 = arith.constant 0 : index
    %c0_31 = arith.constant 0 : index
    %47 = vector.load %arg7[%c0_30, %c0_31] : memref<4x128xf32, #tpu.memory_space<vmem>>, vector<4x128xf32>
    tpu.vector_store %arg7[%c0_30, %c0_31], %46 {strides = array<i32>} : memref<4x128xf32, #tpu.memory_space<vmem>>, vector<4x128xf32>,
    return
  }
  func.func @transform_0(%arg0: i32) -> (i32, i32) {
    %c0_i32 = arith.constant 0 : i32
    %c0_i32_0 = arith.constant 0 : i32
    return %arg0, %c0_i32 : i32, i32
  }
  func.func @transform_1(%arg0: i32) -> (i32, i32) {
    %c0_i32 = arith.constant 0 : i32
    %c0_i32_0 = arith.constant 0 : i32
    %c0_i32_1 = arith.constant 0 : i32
    return %c0_i32, %c0_i32_0 : i32, i32
  }
  func.func @transform_2(%arg0: i32) -> (i32, i32) {
    %c0_i32 = arith.constant 0 : i32
    %c0_i32_0 = arith.constant 0 : i32
    %c0_i32_1 = arith.constant 0 : i32
    return %c0_i32, %c0_i32_0 : i32, i32
  }
  func.func @transform_3(%arg0: i32) -> (i32, i32, i32) {
    %c0_i32 = arith.constant 0 : i32
    %c0_i32_0 = arith.constant 0 : i32
    %c0_i32_1 = arith.constant 0 : i32
    %c0_i32_2 = arith.constant 0 : i32
    return %c0_i32, %c0_i32_0, %c0_i32_1 : i32, i32, i32
  }
  func.func @transform_4(%arg0: i32) -> (i32, i32, i32) {
    %c0_i32 = arith.constant 0 : i32
    %c0_i32_0 = arith.constant 0 : i32
    %c0_i32_1 = arith.constant 0 : i32
    %c0_i32_2 = arith.constant 0 : i32
    return %c0_i32, %c0_i32_0, %c0_i32_1 : i32, i32, i32
  }
  func.func @transform_5(%arg0: i32) -> (i32, i32) {
    %c0_i32 = arith.constant 0 : i32
    %c0_i32_0 = arith.constant 0 : i32
    %c0_i32_1 = arith.constant 0 : i32
    return %c0_i32, %c0_i32_0 : i32, i32
  }
  func.func @transform_6(%arg0: i32) -> (i32, i32) {
    %c0_i32 = arith.constant 0 : i32
    %c0_i32_0 = arith.constant 0 : i32
    return %c0_i32, %arg0 : i32, i32
  }
}

</mosaic_0001>

<bundles_post_ra>
// kernel: deeptree_apply.1
= control target key start
LH: loop header
LB: loop body
LE: loop exit
PB: predicated region body
PF: predicated region fallthrough
CT: control target
= control target key end

     0   :  { %11 = vsyncpa [#allocation3], 0  ;;  %s1292_s0 = inlined_call_operand.vmem [shape: f32[200,64], index: 0, kind: input, shape index: {}]   ;;  %s1293_s1 = inlined_call_operand.vmem [shape: f32[8,64], index: 1, kind: input, shape index: {}]   ;;  %s1294_s2 = inlined_call_operand.vmem [shape: f32[8,1], index: 2, kind: input, shape index: {}]   ;;  %s1295_s3 = inlined_call_operand.vmem [shape: f32[3,8,8], index: 3, kind: input, shape index: {}]   ;;  %s1296_s4 = inlined_call_operand.vmem [shape: f32[3,8,1], index: 4, kind: input, shape index: {}]   ;;  %s1297_s5 = inlined_call_operand.vmem [shape: f32[4,8], index: 5, kind: input, shape index: {}]   ;;  %s1298_s6 = inlined_call_operand.hbm [shape: f32[4,200], index: 6, kind: output, shape index: {}]  }
   0x1   :  { %13 = vsyncpa [#allocation3 + $0x1], 0  ;;  %s1110_s21 = smov 0   ;;  %s1112_s22 = smov 0  }
   0x2   :  { %s1114_s23 = smov 0   ;;  %s1116_s24 = smov 0  }
   0x3 LB: > { %s1131_s25 = sadd.s32 4294967295, %s1069_s24   ;;  %s840_s26 = sadd.s32 4294967294, %s1069_s24   ;;  %s1069_s24 = sphi %s1116_s24, %s1304_s24   ;;  %s1065_s23 = sphi %s1114_s23, %s1303_s23   ;;  %s1061_s22 = sphi %s1112_s22, %s1302_s22   ;;  %s1057_s21 = sphi %s1110_s21, %s1301_s21  }
   0x4   : > { %s1135_s27 = sadd.s32 1, %s1069_s24   ;;  %s157_s28 = sadd.s32 1, %s1065_s23 }
   0x5   : > { %s154_s29 = ssub.s32 %s1069_s24, %s1135_s27  ;;  %p167_p0 = scmp.ne.s32.totalorder %s1065_s23, %s1061_s22 }
   0x6   : > { %p155_p1 = scmp.eq.s32.totalorder %s154_s29, 0  ;;  %p168_p2 = scmp.eq.s32.totalorder %s1131_s25, 1 }
   0x7   : > { %p173_p3 = scmp.ne.s32.totalorder %s1061_s22, %s1057_s21  ;;  %p174_p4 = scmp.eq.s32.totalorder %s840_s26, 1 }
   0x8   : > { %s1146_s30 = scalar_select %p155_p1, %s1065_s23, %s157_s28  }
   0x9   : > { %p1148_p5 = por %p168_p2, %p167_p0  ;;  %p1152_p6 = por %p174_p4, %p173_p3 }
   0xa   : > { %p843_p7 = scmp.ge.s32.totalorder %s1069_s24, 1  ;;  %p224_p8 = scmp.lt.s32.totalorder %s1069_s24, 3 }
   0xc   : > { %p225_p9 = pnand %p843_p7, %p224_p8 }
   0xd   : > { %s845_s9 = sshll.u32 (!%p225_p9), %s1131_s25, 4  ;;  %s874_s19 = sshll.u32 (!%p225_p9), %s1131_s25, 6 }
   0xe   : > { %228 = sbr.rel (%p225_p9) target bundleno = 790 (0x316), region = 44  ;;  %p263_p10 = scmp.lt.s32.totalorder (!%p225_p9), %s845_s9, 24 }
   0xf   : > { %s1074_s12 = smov (!%p225_p9), [#allocation2]  }
  0x10   : > { %s1013_s13 = sshll.u32 (!%p225_p9), %s1074_s12, 4  ;;  %s1014_s13 = int_to_ptr.vmem [resolvable:$false] %s1013_s13 }
  0x11   : > { %s1015_s25 = scalar_lea.vmem (!%p225_p9), %s1014_s13, 128 }
  0x13   : > { %v1071_v0 = vmov 0.0   ;;  %vm1072_vm0 = vmmov 0   ;;  %v289_v1 = vld [vmem:[%s1294_s2] sm:$0xff]  ;;  %v1073_v2 = vmov 0   ;;  %s1306_s9 = smov (!%p263_p10, %s845_s9), 24  ;;  %vm295_vm1 = vcmask 523264  }
  0x14   : > { %902 = vmatprep.subr.mxu0 %v1071_v0  ;;  %934 = vmatprep.mubr.msk.f32.mxu0 %vm1072_vm0, %v1071_v0  ;;  %v424_v3 = vld [vmem:[%s1296_s4] sm:$0xff]  ;;  %s846_s14 = sshll.u32 %s1306_s9, 3  ;;  %v867_v21 = vld [vmem:[%s1296_s4 + $0x8] sm:$0xff]  ;;  %v870_v22 = vld [vmem:[%s1296_s4 + $0x10] sm:$0xff]  ;;  %vm430_vm2 = vcmask 64512   ;;  %vm744_vm3 = vcmask 1043456   ;;  %s779_s9 = scalar_lea.hbm %s1298_s6, %s874_s19 }
  0x15   : > { %999 = vset.pattern.permute.xlu0 %v1073_v2  ;;  %937 = vmatprep.subr.mxu1 %v1071_v0  ;;  %s1174_s17 = scalar_lea.vmem %s1292_s0, %s846_s14  ;;  %v272_v20 = vld [vmem:[%s1293_s1] sm:$0xff]  ;;  %v866_v32 = vld [vmem:[%s1295_s3 + $0x8] sm:$0xff]  ;;  %v869_v33 = vld [vmem:[%s1295_s3 + $0x10] sm:$0xff] }
  0x16   : > { %292 = vperm.xlu0 %999, %v289_v1   ;;  %939 = vmatprep.mubr.msk.f32.mxu1 %vm1072_vm0, %v1071_v0  ;;  %v288_v4 = vld [vmem:[%s1174_s17 + $0x78] sm:$0xff]  ;;  %v287_v5 = vld [vmem:[%s1174_s17 + $0x70] sm:$0xff]  ;;  %v286_v6 = vld [vmem:[%s1174_s17 + $0x68] sm:$0xff] }
  0x17   : > { %1000 = vset.pattern.permute.xlu1 %v1073_v2  ;;  %903 = vmatpush3.xpose.msk.msra.mxu0 %vm295_vm1, %v288_v4  ;;  %v285_v7 = vld [vmem:[%s1174_s17 + $0x60] sm:$0xff]  ;;  %v284_v8 = vld [vmem:[%s1174_s17 + $0x58] sm:$0xff]  ;;  %v283_v9 = vld [vmem:[%s1174_s17 + $0x50] sm:$0xff] }
  0x18   : > { %904 = vmatprep.subr.mxu0 %v1071_v0  ;;  %v282_v10 = vld [vmem:[%s1174_s17 + $0x48] sm:$0xff]  ;;  %v281_v11 = vld [vmem:[%s1174_s17 + $0x40] sm:$0xff]  ;;  %v280_v12 = vld [vmem:[%s1174_s17 + $0x38] sm:$0xff]  ;;  %510 = vperm.xlu1 %1000, %v867_v21  }
  0x19   : > { %v279_v13 = vld [vmem:[%s1174_s17 + $0x30] sm:$0xff]  ;;  %v278_v14 = vld [vmem:[%s1174_s17 + $0x28] sm:$0xff]  ;;  %v277_v15 = vld [vmem:[%s1174_s17 + $0x20] sm:$0xff] }
  0x1a   : > { %427 = vperm.xlu0 %999, %v424_v3   ;;  %v276_v16 = vld [vmem:[%s1174_s17 + $0x18] sm:$0xff]  ;;  %v275_v17 = vld [vmem:[%s1174_s17 + $0x10] sm:$0xff]  ;;  %v274_v18 = vld [vmem:[%s1174_s17 + $0x8] sm:$0xff] }
  0x1b   : > { %905 = vmatpush3.xpose.msk.msra.mxu0 %vm295_vm1, %v287_v5  ;;  %v273_v19 = vld [vmem:[%s1174_s17] sm:$0xff]  ;;  %s255_s17 = sand.u32 1, %s1061_s22  }
  0x1c   : > { %906 = vmatprep.subr.mxu0 %v1071_v0  ;;  %593 = vperm.xlu1 %1000, %v870_v22   ;;  %v423_v30 = vld [vmem:[%s1295_s3] sm:$0xff]  ;;  %s844_s18 = sshll.u32 %s255_s17, 2  ;;  %s768_s10 = scalar_lea.sflag [#allocation3], %s255_s17 }
  0x1d   : > { %v670_v48 = vld [vmem:[%s1297_s5] sm:$0xf]  ;;  %s257_s20 = scalar_lea.vmem [#allocation2], %s844_s18 }
  0x1e   : > { %s781_s26 = sshll.u32 %s257_s20, 4  ;;  %s782_s26 = int_to_ptr.vmem [resolvable:$true] %s781_s26 }
  0x1f   : > { %907 = vmatpush3.xpose.msk.msra.mxu0 %vm295_vm1, %v286_v6  ;;  %s1009_s11 = scalar_lea.vmem %s782_s26, 64  ;;  %p1016_p0 = scmp.lt.s32.totalorder %s782_s26, %s1014_s13 }
  0x20   : > { %908 = vmatprep.subr.mxu0 %v1071_v0  ;;  %p1010_p11 = scmp.ne.s32.totalorder %s782_s26, %s1009_s11  ;;  %p1017_p1 = scmp.lt.s32.totalorder %s1015_s25, %s1009_s11 }
  0x22   : > { %p1011_p12 = pnand %p1010_p11, %p1148_p5  ;;  %p1018_p2 = por %p1017_p1, %p1016_p0 }
  0x23   : > { %909 = vmatpush3.xpose.msk.msra.mxu0 %vm295_vm1, %v285_v7 }
  0x24   : > { %910 = vmatprep.subr.mxu0 %v1071_v0  ;;  %p1012_p13 = pneg %p1011_p12 }
  0x26   : > { %p1019_p3 = pnand %p1018_p2, %p1012_p13 }
  0x27   : > { %911 = vmatpush3.xpose.msk.msra.mxu0 %vm295_vm1, %v284_v8 }
  0x28   : > { %912 = vmatprep.subr.mxu0 %v1071_v0 }
  0x2b   : > { %913 = vmatpush3.xpose.msk.msra.mxu0 %vm295_vm1, %v283_v9 }
  0x2c   : > { %914 = vmatprep.subr.mxu0 %v1071_v0 }
  0x2f   : > { %915 = vmatpush3.xpose.msk.msra.mxu0 %vm295_vm1, %v282_v10 }
  0x30   : > { %916 = vmatprep.subr.mxu0 %v1071_v0 }
  0x33   : > { %917 = vmatpush3.xpose.msk.msra.mxu0 %vm295_vm1, %v281_v11 }
  0x34   : > { %918 = vmatprep.subr.mxu0 %v1071_v0 }
  0x37   : > { %919 = vmatpush3.xpose.msk.msra.mxu0 %vm295_vm1, %v280_v12 }
  0x38   : > { %920 = vmatprep.subr.mxu0 %v1071_v0 }
  0x3b   : > { %921 = vmatpush3.xpose.msk.msra.mxu0 %vm295_vm1, %v279_v13 }
  0x3c   : > { %922 = vmatprep.subr.mxu0 %v1071_v0 }
  0x3f   : > { %923 = vmatpush3.xpose.msk.msra.mxu0 %vm295_vm1, %v278_v14 }
  0x40   : > { %924 = vmatprep.subr.mxu0 %v1071_v0 }
  0x43   : > { %925 = vmatpush3.xpose.msk.msra.mxu0 %vm295_vm1, %v277_v15 }
  0x44   : > { %926 = vmatprep.subr.mxu0 %v1071_v0 }
  0x47   : > { %927 = vmatpush3.xpose.msk.msra.mxu0 %vm295_vm1, %v276_v16 }
  0x48   : > { %928 = vmatprep.subr.mxu0 %v1071_v0 }
  0x4b   : > { %929 = vmatpush3.xpose.msk.msra.mxu0 %vm295_vm1, %v275_v17 }
  0x4c   : > { %930 = vmatprep.subr.mxu0 %v1071_v0 }
  0x4f   : > { %931 = vmatpush3.xpose.msk.msra.mxu0 %vm295_vm1, %v274_v18 }
  0x50   : > { %932 = vmatprep.subr.mxu0 %v1071_v0 }
  0x53   : > { %933 = vmatpush3.xpose.msk.msra.mxu0 %vm295_vm1, %v273_v19 }
  0x56   : > { %935 = vmatmul.mubr.msk.f32.vlgmr.msra.gmra.mxu0 %vm295_vm1, %v272_v20 }
  0x91   : > { %v293_v23 = vpop.permute.xlu0 %292 }
  0x93   : > { %v511_v35 = vpop.permute.xlu1 %510 }
  0x95   : > { %v428_v39 = vpop.permute.xlu0 %427 }
  0x97   : > { %v594_v42 = vpop.permute.xlu1 %593 }
 0x116   : > { %v413_v24 = vpop.f32.mrf.mxu0 }
 0x117   : > { %v414_v25 = vadd.f32 %v413_v24, %v293_v23 }
 0x118   : > { %v936_v26 = vpop.f32.mrf.mxu0 }
 0x119   : > { %v864_v27 = vmul.f32 -1.442695, %v414_v25 }
 0x11b   : > { %1001 = vpow2.f32 %v864_v27 }
 0x128   : > { %v1002_v28 = vpop.eup %1001 }
 0x129   : > { %v420_v29 = vadd.f32 1.0, %v1002_v28 }
 0x12b   : > { %1003 = vrcp.f32 %v420_v29 }
 0x138   : > { %v1004_v31 = vpop.eup %1003 }
 0x139   : > { %938 = vmatpush3.msra.mxu1 %v1004_v31 }
 0x13a   : > { %940 = vmatmul.mubr.msk.f32.vlgmr.msra.gmra.mxu1 %vm430_vm2, %v423_v30  ;;  %942 = vmatprep.subr.mxu1 %v1071_v0 }
 0x13b   : > { %943 = vmatpush3.msra.mxu1 %v1004_v31  ;;  %944 = vmatprep.mubr.msk.f32.mxu1 %vm1072_vm0, %v1071_v0 }
 0x13c   : > { %947 = vmatprep.subr.mxu1 %v1071_v0 }
 0x13e   : > { %945 = vmatmul.mubr.msk.f32.vlgmr.msra.gmra.mxu1 %vm430_vm2, %v866_v32 }
 0x13f   : > { %948 = vmatpush3.msra.mxu1 %v1004_v31  ;;  %949 = vmatprep.mubr.msk.f32.mxu1 %vm1072_vm0, %v1071_v0 }
 0x140   : > { %952 = vmatprep.subr.mxu1 %v1071_v0 }
 0x142   : > { %950 = vmatmul.mubr.msk.f32.vlgmr.msra.gmra.mxu1 %vm430_vm2, %v869_v33 }
 0x143   : > { %954 = vmatprep.mubr.msk.f32.mxu1 %vm1072_vm0, %v1071_v0 }
 0x1fa   : > { %v500_v34 = vpop.f32.mrf.mxu1 }
 0x1fb   : > { %v501_v41 = vadd.f32 %v500_v34, %v428_v39 }
 0x1fc   : > { %v941_v36 = vpop.f32.mrf.mxu1 }
 0x1fe   : > { %v582_v37 = vpop.f32.mrf.mxu1 }
 0x1ff   : > { %v583_v38 = vadd.f32 %v582_v37, %v511_v35 }
 0x200   : > { %v946_v40 = vpop.f32.mrf.mxu1 }
 0x201   : > { %v586_v44 = vmul.f32 %v583_v38, %v501_v41 }
 0x202   : > { %v665_v43 = vpop.f32.mrf.mxu1 }
 0x203   : > { %v666_v45 = vadd.f32 %v665_v43, %v594_v42 }
 0x204   : > { %v951_v46 = vpop.f32.mrf.mxu1 }
 0x205   : > { %v669_v47 = vmul.f32 %v666_v45, %v586_v44 }
 0x207   : > { %953 = vmatpush3.msra.mxu1 %v669_v47 }
 0x208   : > { %955 = vmatmul.mubr.msk.f32.vlgmr.msra.gmra.mxu1 %vm430_vm2, %v670_v48 }
 0x2c8   : > { %v740_v49 = vpop.f32.mrf.mxu1 }
 0x2c9   : > { %v745_v50 = vsel %vm744_vm3, %v740_v49, -inf }
 0x2ca   : > { %v746_v51 = vrot.slane %v745_v50, 4  ;;  %v956_v52 = vpop.f32.mrf.mxu1 }
 0x2cc   : > { %v747_v53 = vmax.f32 %v745_v50, %v746_v51 }
 0x2ce   : > { %v748_v54 = vrot.slane %v747_v53, 2 }
 0x2d0   : > { %v749_v55 = vmax.f32 %v747_v53, %v748_v54 }
 0x2d2   : > { %v750_v56 = vrot.slane %v749_v55, 1 }
 0x2d4   : > { %v751_v57 = vmax.f32 %v749_v55, %v750_v56 }
 0x2d6   : > { %v752_v58 = vsub.f32 %v740_v49, %v751_v57 }
 0x2d8   : > { %v753_v59 = vmul.f32 1.442695, %v752_v58 }
 0x2da   : > { %1005 = vpow2.f32 %v753_v59 }
 0x2e7   : > { %v1006_v60 = vpop.eup %1005 }
 0x2e8   : > { %v755_v61 = vsel %vm744_vm3, %v1006_v60, 0.0 }
 0x2e9   : > { %v756_v62 = vrot.slane %v755_v61, 4 }
 0x2eb   : > { %v757_v63 = vadd.f32 %v756_v62, %v755_v61 }
 0x2ed   : > { %v758_v0 = vrot.slane %v757_v63, 2 }
 0x2ef   : > { %v759_v1 = vadd.f32 %v758_v0, %v757_v63 }
 0x2f1   : > { %v760_v2 = vrot.slane %v759_v1, 1 }
 0x2f3   : > { %v761_v3 = vadd.f32 %v760_v2, %v759_v1 }
 0x2f5   : > { %1007 = vlog2.f32 %v761_v3 }
 0x302   : > { %v1008_v4 = vpop.eup %1007 }
 0x303   : > { %v763_v5 = vmul.f32 0.6931472, %v1008_v4 }
 0x305   : > { %v764_v6 = vadd.f32 %v763_v5, %v751_v57 }
 0x307   : > { %v765_v7 = vsub.f32 %v740_v49, %v764_v6 }
 0x309   : > { %766 = vst [vmem:[%s257_s20] sm:$0xf] %v765_v7 }
 0x30a   : > { %1022 = shalt.err (!%p1019_p3)
}
 0x30b   : > { %s1023_s14 = scalar_lea.hbm %s779_s9, 64  ;;  %s1027_s17 = scalar_lea.hbm %s1298_s6, 128 }
 0x30c   : > { %p1024_p4 = scmp.ne.s32.totalorder %s779_s9, %s1023_s14  ;;  %p1028_p9 = scmp.lt.s32.totalorder %s779_s9, %s1298_s6 }
 0x30d   : > { %p1029_p10 = scmp.lt.s32.totalorder %s1027_s17, %s1023_s14 }
 0x30e   : > { %p1025_p7 = pnand %p1024_p4, %p1148_p5 }
 0x30f   : > { %p1030_p11 = por %p1029_p10, %p1028_p9 }
 0x310   : > { %p1026_p8 = pneg %p1025_p7 }
 0x312   : > { %p1031_p12 = pnand %p1030_p11, %p1026_p8 }
 0x314   : > { %1034 = shalt.err (!%p1031_p12)
}
 0x315   : > { %957 = dma.vmem_to_hbm [thread:$0]  (%p1148_p5), %s782_s26, 64, %s779_s9, %s768_s10  }
 0x316 PF: > { %p963_p13 = scmp.ge.s32.totalorder %s1069_s24, 2  ;;  %s793_s20 = sand.u32 1, %s1057_s21  }
 0x317   : > { %s794_s28 = scalar_lea.sflag [#allocation3], %s793_s20 }
 0x318   : > { %p960_p0 = pnand %p963_p13, %p1152_p6 }
 0x31a   : > { %p961_p1 = pneg %p960_p0 }
 0x31c   : > { %1052 = dma.done.wait (%p961_p1), %s794_s28, 64  }
 0x31d   : > { %1054 = vsyncadd (%p961_p1), %s794_s28, 4294967232  ;;  %p16_p2 = scmp.ge.s32.totalorder %s1135_s27, 4   ;;  %s1301_s21 = smov %s1061_s22 }
 0x31e   : > { %s1302_s22 = smov %s1065_s23  ;;  %s1303_s23 = smov %s1146_s30 }
 0x31f   : > { %s1304_s24 = smov %s1135_s27  ;;  %18 = sbr.rel (!%p16_p2) target bundleno = 3 (0x3), region = 83 }
 0x324   :  { %799 = vsyncpa [#allocation3], 1 }
 0x325   :  { %801 = vsyncpa [#allocation3 + $0x1], 1 }

</bundles_post_ra>
